<compile_context>
chip_gen: v5e
topology: v5e:2x2
jax: 0.10.0
libtpu: 0.0.40
codegen_flags: <defaults>
</compile_context>

<pallas_src>
import jax
import jax.numpy as jnp
from jax import lax
from jax.experimental import pallas as pl
from jax.experimental.pallas import tpu as pltpu


def _round_up(x, m):
    return (x + m - 1) // m * m


def ffn_kernel(x_ref, w1_ref, w2_ref, o_ref, acc_ref):
    """One (token-tile, hidden-tile) step of  y = relu(x @ W1.T) @ W2.T.

    x_ref  : (tm, D)   token tile (D lane-padded to a multiple of 128)
    w1_ref : (tk, D)   hidden-slice of W1 (rows of the (hidden, dim) weight)
    w2_ref : (D, tk)   hidden-slice of W2 (cols of the (dim, hidden) weight)
    o_ref  : (tm, D)   output tile (resident across the hidden grid axis)
    acc_ref: (tm, D)   f32 accumulator scratch
    """
    k = pl.program_id(1)

    @pl.when(k == 0)
    def _():
        acc_ref[...] = jnp.zeros_like(acc_ref)

    # h_k = relu(x @ W1_k.T): contract last-last -> (tm, tk). Splitting the
    # hidden axis is exact because ReLU is elementwise over hidden.
    h = lax.dot_general(
        x_ref[...], w1_ref[...],
        dimension_numbers=(((1,), (1,)), ((), ())),
        preferred_element_type=jnp.float32)
    h = jnp.maximum(h, 0.0)

    # acc += h_k @ W2_k.T: contract last-last -> (tm, D), accumulate in f32.
    acc_ref[...] += lax.dot_general(
        h.astype(w2_ref.dtype), w2_ref[...],
        dimension_numbers=(((1,), (1,)), ((), ())),
        preferred_element_type=jnp.float32)

    @pl.when(k == pl.num_programs(1) - 1)
    def _():
        o_ref[...] = acc_ref[...].astype(o_ref.dtype)


def ffn_pallas(x, w1, w2, *, tm=256, tk=512):
    """Fused FFN: relu(x @ w1.T) @ w2.T.

    x : (..., dim)
    w1: (hidden_dim, dim)  -- nn.Linear(dim, hidden_dim).weight layout
    w2: (dim, hidden_dim)  -- nn.Linear(hidden_dim, dim).weight layout
    """
    orig_shape = x.shape
    dim = orig_shape[-1]
    hidden = w1.shape[0]
    assert w1.shape == (hidden, dim), "w1 must be (hidden_dim, dim)"
    assert w2.shape == (dim, hidden), "w2 must be (dim, hidden_dim)"

    x2d = x.reshape(-1, dim)
    tokens = x2d.shape[0]

    # ---- tile sizes -------------------------------------------------------
    itemsize = jnp.dtype(x.dtype).itemsize
    sublane = 8 if itemsize == 4 else (16 if itemsize == 2 else 32)
    # Token tile: big enough to fill the MXU, but clamped for tiny inputs.
    tm = max(sublane, min(_round_up(tm, sublane), _round_up(tokens, sublane)))
    t_pad = _round_up(tokens, tm)

    d_pad = _round_up(dim, 128)  # lane-dense output / contraction dims
    tk = max(128, min(_round_up(tk, 128), _round_up(hidden, 128)))
    h_pad = _round_up(hidden, tk)

    # ---- zero-pad to tile boundaries (no-op when already aligned) ---------
    if (t_pad, d_pad) != (tokens, dim):
        x2d = jnp.pad(x2d, ((0, t_pad - tokens), (0, d_pad - dim)))
    w1p = w1 if (h_pad, d_pad) == (hidden, dim) else jnp.pad(
        w1, ((0, h_pad - hidden), (0, d_pad - dim)))
    w2p = w2 if (d_pad, h_pad) == (dim, hidden) else jnp.pad(
        w2, ((0, d_pad - dim), (0, h_pad - hidden)))

    grid = (t_pad // tm, h_pad // tk)

    # Rough VMEM budget: double-buffered x/w1/w2/out tiles + f32 accumulator.
    # Re-derive the 64 MiB cap per generation (v7x has 64 MiB physical VMEM).
    est = (2 * tm * d_pad * itemsize            # x tiles
           + 2 * tk * d_pad * jnp.dtype(w1p.dtype).itemsize   # w1 tiles
           + 2 * d_pad * tk * jnp.dtype(w2p.dtype).itemsize   # w2 tiles
           + 2 * tm * d_pad * itemsize          # out tiles
           + tm * d_pad * 4)                    # accumulator
    vmem_limit = int(min(max(2 * est, 32 * 1024 * 1024), 64 * 1024 * 1024))

    out = pl.pallas_call(
        ffn_kernel,
        out_shape=jax.ShapeDtypeStruct((t_pad, d_pad), x.dtype),
        grid_spec=pltpu.PrefetchScalarGridSpec(
            num_scalar_prefetch=0,
            grid=grid,
            in_specs=[
                pl.BlockSpec((tm, d_pad), lambda i, k: (i, 0)),   # x
                pl.BlockSpec((tk, d_pad), lambda i, k: (k, 0)),   # W1 rows
                pl.BlockSpec((d_pad, tk), lambda i, k: (0, k)),   # W2 cols
            ],
            out_specs=pl.BlockSpec((tm, d_pad), lambda i, k: (i, 0)),
            scratch_shapes=[pltpu.VMEM((tm, d_pad), jnp.float32)],
        ),
        compiler_params=pltpu.CompilerParams(
            dimension_semantics=("parallel", "arbitrary"),
            vmem_limit_bytes=vmem_limit),
    )(x2d, w1p, w2p)

    return out[:tokens, :dim].reshape(orig_shape)


def ffn_reference(x, w1, w2):
    h = jnp.maximum(x @ w1.T, 0.0)
    return h @ w2.T


if __name__ == "__main__":
    # Small shapes consistent with the module: dim=32, hidden_dim=64,
    # input (batch=2, seq=8, dim=32); linear layers act on the last axis.
    batch, seq, dim, hidden = 2, 8, 32, 64

    key = jax.random.PRNGKey(0)
    kx, k1, k2 = jax.random.split(key, 3)
    x = jax.random.normal(kx, (batch, seq, dim), dtype=jnp.float32)
    # Deterministic parameters in nn.Linear(out, in) weight layout.
    w1 = jax.random.normal(k1, (hidden, dim), dtype=jnp.float32) * 0.05
    w2 = jax.random.normal(k2, (dim, hidden), dtype=jnp.float32) * 0.05

    # TODO(synk): world_size>1 tensor-parallel sharding / all-reduce of
    # Column/RowParallelLinear is not modeled; this is the world_size=1 path.
    y = ffn_pallas(x, w1, w2)
    jax.block_until_ready(y)

    y_ref = ffn_reference(x, w1, w2)
    assert y.shape == (batch, seq, dim)
    assert jnp.allclose(y, y_ref, atol=1e-5, rtol=1e-5)

    print("KERNEL_OK")
</pallas_src>

<mosaic_0001>
module attributes {stable_mosaic.version = 11 : i64} {
  func.func @ffn_kernel(%arg0: i32, %arg1: i32, %arg2: memref<16x128xf32, #tpu.memory_space<vmem>>, %arg3: memref<128x128xf32, #tpu.memory_space<vmem>>, %arg4: memref<128x128xf32, #tpu.memory_space<vmem>>, %arg5: memref<16x128xf32, #tpu.memory_space<vmem>>, %arg6: memref<16x128xf32, #tpu.memory_space<vmem>>) attributes {dimension_semantics = [#tpu.dimension_semantics<parallel>, #tpu.dimension_semantics<arbitrary>], iteration_bounds = array<i64: 1, 1>, scalar_prefetch = 0 : i64, scratch_operands = 1 : i64, tpu.core_type = #tpu.core_type<tc>, window_params = [{transform_indices = @transform_0, window_bounds = array<i64: 16, 128>}, {transform_indices = @transform_1, window_bounds = array<i64: 128, 128>}, {transform_indices = @transform_2, window_bounds = array<i64: 128, 128>}, {transform_indices = @transform_3, window_bounds = array<i64: 16, 128>}]} {
    %c0_i32 = arith.constant 0 : i32
    %0 = arith.cmpi eq, %arg1, %c0_i32 : i32
    %1 = arith.extui %0 : i1 to i32
    %c0_i32_0 = arith.constant 0 : i32
    %2 = arith.cmpi ne, %1, %c0_i32_0 : i32
    scf.if %2 {
      %cst_14 = arith.constant 0.000000e+00 : f32
      %16 = vector.broadcast %cst_14 : f32 to vector<16x128xf32>
      %c0_15 = arith.constant 0 : index
      %c0_16 = arith.constant 0 : index
      %17 = vector.load %arg6[%c0_15, %c0_16] : memref<16x128xf32, #tpu.memory_space<vmem>>, vector<16x128xf32>
      tpu.vector_store %arg6[%c0_15, %c0_16], %16 {strides = array<i32>} : memref<16x128xf32, #tpu.memory_space<vmem>>, vector<16x128xf32>,
    } else {
    }
    %c0 = arith.constant 0 : index
    %c0_1 = arith.constant 0 : index
    %3 = vector.load %arg2[%c0, %c0_1] : memref<16x128xf32, #tpu.memory_space<vmem>>, vector<16x128xf32>
    %c0_2 = arith.constant 0 : index
    %c0_3 = arith.constant 0 : index
    %4 = vector.load %arg3[%c0_2, %c0_3] : memref<128x128xf32, #tpu.memory_space<vmem>>, vector<128x128xf32>
    %cst = arith.constant dense<0.000000e+00> : vector<16x128xf32>
    %5 = tpu.matmul %3, %4, %cst {dimension_numbers = #tpu.dot_dimension_numbers<[1], [1], [0], [0], [0, 0, 1, 0], [], []>} : vector<16x128xf32>, vector<128x128xf32>, vector<16x128xf32> -> vector<16x128xf32>
    %cst_4 = arith.constant 0.000000e+00 : f32
    %6 = vector.broadcast %cst_4 : f32 to vector<16x128xf32>
    %7 = arith.maximumf %5, %6 : vector<16x128xf32>
    %c0_5 = arith.constant 0 : index
    %c0_6 = arith.constant 0 : index
    %8 = vector.load %arg6[%c0_5, %c0_6] : memref<16x128xf32, #tpu.memory_space<vmem>>, vector<16x128xf32>
    %c0_7 = arith.constant 0 : index
    %c0_8 = arith.constant 0 : index
    %9 = vector.load %arg4[%c0_7, %c0_8] : memref<128x128xf32, #tpu.memory_space<vmem>>, vector<128x128xf32>
    %cst_9 = arith.constant dense<0.000000e+00> : vector<16x128xf32>
    %10 = tpu.matmul %7, %9, %cst_9 {dimension_numbers = #tpu.dot_dimension_numbers<[1], [1], [0], [0], [0, 0, 1, 0], [], []>} : vector<16x128xf32>, vector<128x128xf32>, vector<16x128xf32> -> vector<16x128xf32>
    %11 = arith.addf %8, %10 : vector<16x128xf32>
    %c0_10 = arith.constant 0 : index
    %c0_11 = arith.constant 0 : index
    %12 = vector.load %arg6[%c0_10, %c0_11] : memref<16x128xf32, #tpu.memory_space<vmem>>, vector<16x128xf32>
    tpu.vector_store %arg6[%c0_10, %c0_11], %11 {strides = array<i32>} : memref<16x128xf32, #tpu.memory_space<vmem>>, vector<16x128xf32>,
    %c0_i32_12 = arith.constant 0 : i32
    %13 = arith.cmpi eq, %arg1, %c0_i32_12 : i32
    %14 = arith.extui %13 : i1 to i32
    %c0_i32_13 = arith.constant 0 : i32
    %15 = arith.cmpi ne, %14, %c0_i32_13 : i32
    scf.if %15 {
      %c0_14 = arith.constant 0 : index
      %c0_15 = arith.constant 0 : index
      %16 = vector.load %arg6[%c0_14, %c0_15] : memref<16x128xf32, #tpu.memory_space<vmem>>, vector<16x128xf32>
      %c0_16 = arith.constant 0 : index
      %c0_17 = arith.constant 0 : index
      %17 = vector.load %arg5[%c0_16, %c0_17] : memref<16x128xf32, #tpu.memory_space<vmem>>, vector<16x128xf32>
      tpu.vector_store %arg5[%c0_16, %c0_17], %16 {strides = array<i32>} : memref<16x128xf32, #tpu.memory_space<vmem>>, vector<16x128xf32>,
    } else {
    }
    return
  }
  func.func @transform_0(%arg0: i32, %arg1: i32) -> (i32, i32) {
    %c0_i32 = arith.constant 0 : i32
    %c0_i32_0 = arith.constant 0 : i32
    return %arg0, %c0_i32 : i32, i32
  }
  func.func @transform_1(%arg0: i32, %arg1: i32) -> (i32, i32) {
    %c0_i32 = arith.constant 0 : i32
    %c0_i32_0 = arith.constant 0 : i32
    return %arg1, %c0_i32 : i32, i32
  }
  func.func @transform_2(%arg0: i32, %arg1: i32) -> (i32, i32) {
    %c0_i32 = arith.constant 0 : i32
    %c0_i32_0 = arith.constant 0 : i32
    return %c0_i32, %arg1 : i32, i32
  }
  func.func @transform_3(%arg0: i32, %arg1: i32) -> (i32, i32) {
    %c0_i32 = arith.constant 0 : i32
    %c0_i32_0 = arith.constant 0 : i32
    return %arg0, %c0_i32 : i32, i32
  }
}

</mosaic_0001>

<bundles_post_ra>
// kernel: tpu_custom_call.1
= control target key start
LH: loop header
LB: loop body
LE: loop exit
PB: predicated region body
PF: predicated region fallthrough
CT: control target
= control target key end

     0   :  { %8 = vsyncpa [#allocation4], 0  ;;  %s373_s0 = inlined_call_operand.hbm [shape: f32[16,128], index: 0, kind: input, shape index: {}]   ;;  %s374_s1 = inlined_call_operand.hbm [shape: f32[128,128], index: 1, kind: input, shape index: {}]   ;;  %s375_s2 = inlined_call_operand.hbm [shape: f32[128,128], index: 2, kind: input, shape index: {}]   ;;  %s376_s3 = inlined_call_operand.hbm [shape: f32[16,128], index: 3, kind: output, shape index: {}]  }
   0x1   :  { %9 = vsyncpa [#allocation7], 0 }
   0x2   :  { %10 = vsyncpa [#allocation5], 0  ;;  %s28_s14 = sshll.u32 %s374_s1, 4  ;;  %s323_s15 = smov [#allocation6]   ;;  %s29_s14 = int_to_ptr.hbm [resolvable:$true] %s28_s14 }
   0x3   :  { %s30_s16 = sshll.u32 %s323_s15, 4  ;;  %s15_s19 = sshll.u32 %s373_s0, 4  ;;  %s31_s16 = int_to_ptr.vmem [resolvable:$true] %s30_s16  ;;  %s16_s19 = int_to_ptr.hbm [resolvable:$true] %s15_s19 }
   0x4   :  { %s324_s20 = smov 128   ;;  %s325_s21 = smov 8  }
   0x5   :  { %36 = dma.hbm_to_vmem [thread:$0]  %s29_s14, 2048, %s31_s16, [#allocation7], %s324_s20, %s324_s20, %s325_s21  }
   0x6   :  { %s326_s22 = smov [#allocation3]   ;;  %s41_s1 = sshll.u32 %s375_s2, 4  ;;  %s42_s1 = int_to_ptr.hbm [resolvable:$true] %s41_s1 }
   0x7   :  { %s17_s23 = sshll.u32 %s326_s22, 4  ;;  %s327_s0 = smov [#allocation8]   ;;  %s18_s23 = int_to_ptr.vmem [resolvable:$true] %s17_s23 }
   0x8   :  { %23 = dma.hbm_to_vmem [thread:$0]  %s16_s19, 256, %s18_s23, [#allocation4], %s324_s20, %s324_s20, %s325_s21  }
   0x9   :  { %s43_s26 = sshll.u32 %s327_s0, 4  ;;  %s44_s26 = int_to_ptr.vmem [resolvable:$true] %s43_s26 }
   0xa   :  { %49 = dma.hbm_to_vmem [thread:$0]  %s42_s1, 2048, %s44_s26, [#allocation7], %s324_s20, %s324_s20, %s325_s21  }
   0xb   :  { %317 = dma.done.wait [#allocation4], 256  }
   0xc   :  { %318 = vsyncadd [#allocation4], 4294967040 }
   0xd   :  { %319 = dma.done.wait [#allocation7], 4096  }
   0xe   :  { %320 = vsyncadd [#allocation7], 4294963200  ;;  %v85_v0 = vld [vmem:[#allocation6 + $0x78] sm:$0xff]  ;;  %v84_v1 = vld [vmem:[#allocation6 + $0x70] sm:$0xff]  ;;  %s328_s2 = smov [#allocation9]   ;;  %s169_s30 = sshll.u32 %s376_s3, 4  ;;  %s170_s30 = int_to_ptr.hbm [resolvable:$true] %s169_s30 }
   0xf   :  { %183 = vmatpush.xpose.msra.mxu2 %v85_v0  ;;  %86 = vmatpush.xpose.msra.mxu0 %v85_v0  ;;  %v83_v2 = vld [vmem:[#allocation6 + $0x68] sm:$0xff]  ;;  %v82_v3 = vld [vmem:[#allocation6 + $0x60] sm:$0xff]  ;;  %v81_v4 = vld [vmem:[#allocation6 + $0x58] sm:$0xff]  ;;  %s167_s27 = sshll.u32 %s328_s2, 4  ;;  %s168_s27 = int_to_ptr.vmem [resolvable:$true] %s167_s27 }
  0x10   :  { %v80_v5 = vld [vmem:[#allocation6 + $0x50] sm:$0xff]  ;;  %v79_v6 = vld [vmem:[#allocation6 + $0x48] sm:$0xff]  ;;  %v78_v7 = vld [vmem:[#allocation6 + $0x40] sm:$0xff] }
  0x11   :  { %v77_v8 = vld [vmem:[#allocation6 + $0x38] sm:$0xff]  ;;  %v76_v10 = vld [vmem:[#allocation6 + $0x30] sm:$0xff]  ;;  %v75_v12 = vld [vmem:[#allocation6 + $0x28] sm:$0xff] }
  0x12   :  { %v128_v9 = vld [vmem:[#allocation8 + $0x78] sm:$0xff]  ;;  %v127_v11 = vld [vmem:[#allocation8 + $0x70] sm:$0xff]  ;;  %v126_v13 = vld [vmem:[#allocation8 + $0x68] sm:$0xff] }
  0x13   :  { %184 = vmatpush.xpose.msra.mxu2 %v84_v1  ;;  %87 = vmatpush.xpose.msra.mxu0 %v84_v1  ;;  %v74_v14 = vld [vmem:[#allocation6 + $0x20] sm:$0xff]  ;;  %v73_v16 = vld [vmem:[#allocation6 + $0x18] sm:$0xff]  ;;  %v72_v18 = vld [vmem:[#allocation6 + $0x10] sm:$0xff] }
  0x14   :  { %199 = vmatpush.xpose.msra.mxu3 %v128_v9  ;;  %129 = vmatpush.xpose.msra.mxu1 %v128_v9  ;;  %v125_v15 = vld [vmem:[#allocation8 + $0x60] sm:$0xff]  ;;  %v124_v17 = vld [vmem:[#allocation8 + $0x58] sm:$0xff]  ;;  %v123_v19 = vld [vmem:[#allocation8 + $0x50] sm:$0xff] }
  0x15   :  { %v71_v20 = vld [vmem:[#allocation6 + $0x8] sm:$0xff]  ;;  %v70_v22 = vld [vmem:[#allocation6] sm:$0xff]  ;;  %v69_v24 = vld [vmem:[#allocation3 + $0x8] sm:$0xff] }
  0x16   :  { %v122_v21 = vld [vmem:[#allocation8 + $0x48] sm:$0xff]  ;;  %v121_v23 = vld [vmem:[#allocation8 + $0x40] sm:$0xff]  ;;  %v68_v25 = vld [vmem:[#allocation3] sm:$0xff] }
  0x17   :  { %185 = vmatpush.xpose.msra.mxu2 %v83_v2  ;;  %88 = vmatpush.xpose.msra.mxu0 %v83_v2  ;;  %v120_v26 = vld [vmem:[#allocation8 + $0x38] sm:$0xff]  ;;  %v119_v27 = vld [vmem:[#allocation8 + $0x30] sm:$0xff]  ;;  %v118_v28 = vld [vmem:[#allocation8 + $0x28] sm:$0xff] }
  0x18   :  { %200 = vmatpush.xpose.msra.mxu3 %v127_v11  ;;  %130 = vmatpush.xpose.msra.mxu1 %v127_v11  ;;  %v117_v29 = vld [vmem:[#allocation8 + $0x20] sm:$0xff]  ;;  %v116_v30 = vld [vmem:[#allocation8 + $0x18] sm:$0xff]  ;;  %v115_v31 = vld [vmem:[#allocation8 + $0x10] sm:$0xff] }
  0x19   :  { %v114_v32 = vld [vmem:[#allocation8 + $0x8] sm:$0xff]  ;;  %v113_v33 = vld [vmem:[#allocation8] sm:$0xff] }
  0x1b   :  { %186 = vmatpush.xpose.msra.mxu2 %v82_v3  ;;  %89 = vmatpush.xpose.msra.mxu0 %v82_v3 }
  0x1c   :  { %201 = vmatpush.xpose.msra.mxu3 %v126_v13  ;;  %131 = vmatpush.xpose.msra.mxu1 %v126_v13 }
  0x1f   :  { %187 = vmatpush.xpose.msra.mxu2 %v81_v4  ;;  %90 = vmatpush.xpose.msra.mxu0 %v81_v4 }
  0x20   :  { %202 = vmatpush.xpose.msra.mxu3 %v125_v15  ;;  %132 = vmatpush.xpose.msra.mxu1 %v125_v15 }
  0x23   :  { %188 = vmatpush.xpose.msra.mxu2 %v80_v5  ;;  %91 = vmatpush.xpose.msra.mxu0 %v80_v5 }
  0x24   :  { %203 = vmatpush.xpose.msra.mxu3 %v124_v17  ;;  %133 = vmatpush.xpose.msra.mxu1 %v124_v17 }
  0x27   :  { %189 = vmatpush.xpose.msra.mxu2 %v79_v6  ;;  %92 = vmatpush.xpose.msra.mxu0 %v79_v6 }
  0x28   :  { %204 = vmatpush.xpose.msra.mxu3 %v123_v19  ;;  %134 = vmatpush.xpose.msra.mxu1 %v123_v19 }
  0x2b   :  { %190 = vmatpush.xpose.msra.mxu2 %v78_v7  ;;  %93 = vmatpush.xpose.msra.mxu0 %v78_v7 }
  0x2c   :  { %205 = vmatpush.xpose.msra.mxu3 %v122_v21  ;;  %135 = vmatpush.xpose.msra.mxu1 %v122_v21 }
  0x2f   :  { %191 = vmatpush.xpose.msra.mxu2 %v77_v8  ;;  %94 = vmatpush.xpose.msra.mxu0 %v77_v8 }
  0x30   :  { %206 = vmatpush.xpose.msra.mxu3 %v121_v23  ;;  %136 = vmatpush.xpose.msra.mxu1 %v121_v23 }
  0x33   :  { %192 = vmatpush.xpose.msra.mxu2 %v76_v10  ;;  %95 = vmatpush.xpose.msra.mxu0 %v76_v10 }
  0x34   :  { %207 = vmatpush.xpose.msra.mxu3 %v120_v26  ;;  %137 = vmatpush.xpose.msra.mxu1 %v120_v26 }
  0x37   :  { %193 = vmatpush.xpose.msra.mxu2 %v75_v12  ;;  %96 = vmatpush.xpose.msra.mxu0 %v75_v12 }
  0x38   :  { %208 = vmatpush.xpose.msra.mxu3 %v119_v27  ;;  %138 = vmatpush.xpose.msra.mxu1 %v119_v27 }
  0x3b   :  { %194 = vmatpush.xpose.msra.mxu2 %v74_v14  ;;  %97 = vmatpush.xpose.msra.mxu0 %v74_v14 }
  0x3c   :  { %209 = vmatpush.xpose.msra.mxu3 %v118_v28  ;;  %139 = vmatpush.xpose.msra.mxu1 %v118_v28 }
  0x3f   :  { %195 = vmatpush.xpose.msra.mxu2 %v73_v16  ;;  %98 = vmatpush.xpose.msra.mxu0 %v73_v16 }
  0x40   :  { %210 = vmatpush.xpose.msra.mxu3 %v117_v29  ;;  %140 = vmatpush.xpose.msra.mxu1 %v117_v29 }
  0x43   :  { %196 = vmatpush.xpose.msra.mxu2 %v72_v18  ;;  %99 = vmatpush.xpose.msra.mxu0 %v72_v18 }
  0x44   :  { %211 = vmatpush.xpose.msra.mxu3 %v116_v30  ;;  %141 = vmatpush.xpose.msra.mxu1 %v116_v30 }
  0x47   :  { %197 = vmatpush.xpose.msra.mxu2 %v71_v20  ;;  %100 = vmatpush.xpose.msra.mxu0 %v71_v20 }
  0x48   :  { %212 = vmatpush.xpose.msra.mxu3 %v115_v31  ;;  %142 = vmatpush.xpose.msra.mxu1 %v115_v31 }
  0x4b   :  { %198 = vmatpush.xpose.msra.mxu2 %v70_v22  ;;  %101 = vmatpush.xpose.msra.mxu0 %v70_v22 }
  0x4c   :  { %213 = vmatpush.xpose.msra.mxu3 %v114_v32  ;;  %143 = vmatpush.xpose.msra.mxu1 %v114_v32 }
  0x4e   :  { %105 = vmatmul.f32.vlgmr.msra.gmra.mxu2 %v69_v24  ;;  %102 = vmatmul.f32.vlgmr.msra.gmra.mxu0 %v68_v25 }
  0x50   :  { %214 = vmatpush.xpose.msra.mxu3 %v113_v33  ;;  %144 = vmatpush.xpose.msra.mxu1 %v113_v33 }
  0xcb   :  { %v103_v34 = vpop.f32.mrf.mxu0 }
  0xcc   :  { %v109_v35 = vmax.f32 %v103_v34, 0.0 }
  0xce   :  { %145 = vmatmul.f32.vlgmr.msra.gmra.mxu1 %v109_v35 }
  0xd1   :  { %v106_v36 = vpop.f32.mrf.mxu2 }
  0xd2   :  { %v110_v37 = vmax.f32 %v106_v36, 0.0 }
  0xd4   :  { %148 = vmatmul.f32.vlgmr.msra.gmra.mxu3 %v110_v37 }
 0x14b   :  { %v146_v38 = vpop.f32.mrf.mxu1 }
 0x14c   :  { %161 = vst [vmem:[#allocation9] sm:$0xff] %v146_v38 }
 0x157   :  { %v149_v39 = vpop.f32.mrf.mxu3 }
 0x158   :  { %162 = vst [vmem:[#allocation9 + $0x8] sm:$0xff] %v149_v39 }
 0x159   :  { %175 = dma.vmem_to_hbm [thread:$0]  %s168_s27, 256, %s170_s30, [#allocation5], %s324_s20, %s324_s20, %s325_s21  }
 0x15a   :  { %321 = dma.done.wait [#allocation5], 256  }
 0x15b   :  { %322 = vsyncadd [#allocation5], 4294967040 }
 0x15c   :  { %180 = vsyncpa [#allocation4], 1 }
 0x15d   :  { %181 = vsyncpa [#allocation7], 1 }
 0x15e   :  { %182 = vsyncpa [#allocation5], 1 }

</bundles_post_ra>
